<compile_context>
chip_gen: v6e
topology: v6e:2x2x1
jax: 0.10.0
libtpu: 0.0.40
codegen_flags: <defaults>
</compile_context>

<pallas_src>
import functools

import jax
import jax.numpy as jnp
from jax.experimental import pallas as pl
from jax.experimental.pallas import tpu as pltpu


def _round_up(n, m):
    return ((n + m - 1) // m) * m


def _lstm_gen_kernel(x_ref, wih_ref, bg_ref, wlin_ref, blin_ref, out_ref, *,
                     hidden_dim, ts_dim):
    H = hidden_dim

    # In-kernel cast of x to the matmul operand dtype (free VPU op on the loaded
    # tile; avoids a separate wrapper-side cast pass over HBM).
    x = x_ref[...].astype(wih_ref.dtype)

    # Gate pre-activations: (Bblk, 3H), columns packed offline as [i | o | g].
    # h0 == 0 so the W_hh contribution is zero; the dead f gate was dropped offline.
    gates = jnp.dot(x, wih_ref[...],
                    preferred_element_type=jnp.float32) + bg_ref[...]

    sig = jax.nn.sigmoid(gates[:, :2 * H])        # covers i and o in one EUP pass
    i_g = sig[:, 0 * H:1 * H]
    o_g = sig[:, 1 * H:2 * H]
    g_g = jnp.tanh(gates[:, 2 * H:3 * H])

    c = i_g * g_g                                  # f_g * c0 == 0
    h = o_g * jnp.tanh(c)                          # (Bblk, H), f32

    # Linear layer on a lane-dense 128-padded tile (MXU-friendly), but only the
    # useful ts_dim columns are stored to HBM (masked 8-lane store << 16x padded
    # f32 writeback + extra wrapper slice pass).
    out = jnp.dot(h.astype(wlin_ref.dtype), wlin_ref[...],
                  preferred_element_type=jnp.float32) + blin_ref[...]
    out_ref[...] = out[:, :ts_dim].astype(out_ref.dtype)


def prepare_params(w_ih, b_ih, b_hh, w_lin, b_lin, *, matmul_dtype=jnp.bfloat16):
    """One-time parameter prep (kept OUT of the per-call hot path).

    PyTorch conventions in, kernel-friendly layout out:
      w_ih : (4H, L)     -> (L, 3H) transposed, gate columns repacked [i|o|g]
                            (dead f gate dropped), cast to matmul_dtype
      b_ih, b_hh : (4H,) -> fused, repacked (1, 3H) float32 bias
      w_lin: (ts_dim, H) -> (H, out_pad) transposed + zero-padded to 128 lanes
      b_lin: (ts_dim,)   -> (1, out_pad) zero-padded float32
    """
    four_h, _ = w_ih.shape
    H = four_h // 4
    ts_dim, _ = w_lin.shape
    out_pad = _round_up(ts_dim, 128)

    # PyTorch gate row order in W_ih / biases: [i, f, g, o]. Repack to [i, o, g].
    wih_t = jnp.transpose(w_ih).astype(matmul_dtype)                    # (L, 4H)
    wih_iog = jnp.concatenate(
        [wih_t[:, 0 * H:1 * H], wih_t[:, 3 * H:4 * H], wih_t[:, 2 * H:3 * H]],
        axis=1)                                                         # (L, 3H)
    b = (b_ih + b_hh).astype(jnp.float32)
    bg = jnp.concatenate(
        [b[0 * H:1 * H], b[3 * H:4 * H], b[2 * H:3 * H]]).reshape(1, 3 * H)

    wlin_t = jnp.zeros((H, out_pad), matmul_dtype).at[:, :ts_dim].set(
        jnp.transpose(w_lin).astype(matmul_dtype))                      # (H, out_pad)
    blin = jnp.zeros((1, out_pad), jnp.float32).at[0, :ts_dim].set(
        b_lin.astype(jnp.float32))                                      # (1, out_pad)
    return wih_iog, bg, wlin_t, blin


def lstm_generator_forward(x, params, *, hidden_dim, ts_dim,
                           block_b=1024, grid_free_max_b=256, out_dtype=None):
    """x: (B, latent_dim).  params: output of prepare_params()."""
    wih_t, bg, wlin_t, blin = params
    B, L = x.shape
    H = hidden_dim
    three_h = wih_t.shape[1]
    out_pad = wlin_t.shape[1]
    out_dtype = x.dtype if out_dtype is None else out_dtype

    kernel = functools.partial(_lstm_gen_kernel, hidden_dim=H, ts_dim=ts_dim)

    if B <= grid_free_max_b:
        # Grid-free: whole problem lives in VMEM; no pipeline prologue/epilogue,
        # no double-buffered copies of the (tiny) weights.
        out = pl.pallas_call(
            kernel,
            out_shape=jax.ShapeDtypeStruct((B, ts_dim), out_dtype),
            in_specs=[pl.BlockSpec(memory_space=pltpu.MemorySpace.VMEM)] * 5,
            out_specs=pl.BlockSpec(memory_space=pltpu.MemorySpace.VMEM),
        )(x, wih_t, bg, wlin_t, blin)
    else:
        # Batched: tile only the batch axis; weights stay VMEM-resident (block
        # (0, 0)).  Cap the tile so the grid has >= 2 steps: the "parallel" batch
        # axis then shards across both TensorCores on v7x, and bigger tiles keep
        # v5e/v6e near the HBM roofline.
        bb = min(block_b, _round_up(pl.cdiv(B, 2), 8))
        grid = (pl.cdiv(B, bb),)
        out = pl.pallas_call(
            kernel,
            out_shape=jax.ShapeDtypeStruct((B, ts_dim), out_dtype),
            grid_spec=pltpu.PrefetchScalarGridSpec(
                num_scalar_prefetch=0,
                grid=grid,
                in_specs=[
                    pl.BlockSpec((bb, L), lambda i: (i, 0)),
                    pl.BlockSpec((L, three_h), lambda i: (0, 0)),
                    pl.BlockSpec((1, three_h), lambda i: (0, 0)),
                    pl.BlockSpec((H, out_pad), lambda i: (0, 0)),
                    pl.BlockSpec((1, out_pad), lambda i: (0, 0)),
                ],
                out_specs=pl.BlockSpec((bb, ts_dim), lambda i: (i, 0)),
            ),
            compiler_params=pltpu.CompilerParams(
                dimension_semantics=("parallel",)),
        )(x, wih_t, bg, wlin_t, blin)
    return out


def _reference_forward(x, w_ih, b_ih, b_hh, w_lin, b_lin, hidden_dim,
                       matmul_dtype=jnp.float32):
    """Plain-JAX reference of the same math (matching matmul operand dtype)."""
    H = hidden_dim
    gates = jnp.dot(x.astype(matmul_dtype), w_ih.T.astype(matmul_dtype),
                    preferred_element_type=jnp.float32) + (b_ih + b_hh)
    i_g = jax.nn.sigmoid(gates[:, 0 * H:1 * H])
    g_g = jnp.tanh(gates[:, 2 * H:3 * H])
    o_g = jax.nn.sigmoid(gates[:, 3 * H:4 * H])
    h = o_g * jnp.tanh(i_g * g_g)
    return jnp.dot(h.astype(matmul_dtype), w_lin.T.astype(matmul_dtype),
                   preferred_element_type=jnp.float32) + b_lin


if __name__ == "__main__":
    latent_dim = 32
    hidden_dim = 32
    ts_dim = 8

    key = jax.random.PRNGKey(0)
    kx1, kx2, k1, k2, k3, k4, k5 = jax.random.split(key, 7)

    # PyTorch-style U(-1/sqrt(H), 1/sqrt(H)) parameter init.
    s = 1.0 / jnp.sqrt(jnp.float32(hidden_dim))
    w_ih = jax.random.uniform(k1, (4 * hidden_dim, latent_dim), jnp.float32, -s, s)
    b_ih = jax.random.uniform(k2, (4 * hidden_dim,), jnp.float32, -s, s)
    b_hh = jax.random.uniform(k3, (4 * hidden_dim,), jnp.float32, -s, s)
    w_lin = jax.random.uniform(k4, (ts_dim, hidden_dim), jnp.float32, -s, s)
    b_lin = jax.random.uniform(k5, (ts_dim,), jnp.float32, -s, s)

    # --- Path 1: small batch, f32 matmuls, grid-free call (tight tolerance). ---
    batch_small = 8
    x_small = jax.random.normal(kx1, (batch_small, latent_dim), jnp.float32)
    params_f32 = prepare_params(w_ih, b_ih, b_hh, w_lin, b_lin,
                                matmul_dtype=jnp.float32)
    out_small = lstm_generator_forward(x_small, params_f32,
                                       hidden_dim=hidden_dim, ts_dim=ts_dim)
    out_small = jax.block_until_ready(out_small)
    ref_small = _reference_forward(x_small, w_ih, b_ih, b_hh, w_lin, b_lin,
                                   hidden_dim, jnp.float32)
    assert out_small.shape == (batch_small, ts_dim)
    assert jnp.allclose(out_small, ref_small, atol=1e-5, rtol=1e-5)

    # --- Path 2: larger batch, bf16 matmul operands (f32 accumulate), batch-tiled
    #             grid with >= 2 steps (both v7x TensorCores active). ---
    batch_big = 512
    x_big = jax.random.normal(kx2, (batch_big, latent_dim), jnp.float32)
    params_bf16 = prepare_params(w_ih, b_ih, b_hh, w_lin, b_lin,
                                 matmul_dtype=jnp.bfloat16)
    out_big = lstm_generator_forward(x_big, params_bf16,
                                     hidden_dim=hidden_dim, ts_dim=ts_dim,
                                     block_b=1024)
    out_big = jax.block_until_ready(out_big)
    ref_big = _reference_forward(x_big, w_ih, b_ih, b_hh, w_lin, b_lin,
                                 hidden_dim, jnp.bfloat16)
    assert out_big.shape == (batch_big, ts_dim)
    assert jnp.allclose(out_big, ref_big, atol=1e-2, rtol=1e-2)

    print("KERNEL_OK")
</pallas_src>

<mosaic_0001>
module attributes {stable_mosaic.version = 11 : i64} {
  func.func @_lstm_gen_kernel(%arg0: memref<8x32xf32, #tpu.memory_space<vmem>>, %arg1: memref<32x96xf32, #tpu.memory_space<vmem>>, %arg2: memref<1x96xf32, #tpu.memory_space<vmem>>, %arg3: memref<32x128xf32, #tpu.memory_space<vmem>>, %arg4: memref<1x128xf32, #tpu.memory_space<vmem>>, %arg5: memref<8x8xf32, #tpu.memory_space<vmem>>) attributes {dimension_semantics = [], scalar_prefetch = 0 : i64, scratch_operands = 0 : i64, tpu.core_type = #tpu.core_type<tc>} {
    %c0 = arith.constant 0 : index
    %c0_0 = arith.constant 0 : index
    %0 = vector.load %arg0[%c0, %c0_0] : memref<8x32xf32, #tpu.memory_space<vmem>>, vector<8x32xf32>
    %c0_1 = arith.constant 0 : index
    %c0_2 = arith.constant 0 : index
    %1 = vector.load %arg1[%c0_1, %c0_2] : memref<32x96xf32, #tpu.memory_space<vmem>>, vector<32x96xf32>
    %cst = arith.constant dense<0.000000e+00> : vector<8x96xf32>
    %2 = tpu.matmul %0, %1, %cst {dimension_numbers = #tpu.dot_dimension_numbers<[1], [0], [0], [1], [0, 0, 1, 1], [], []>} : vector<8x32xf32>, vector<32x96xf32>, vector<8x96xf32> -> vector<8x96xf32>
    %c0_3 = arith.constant 0 : index
    %c0_4 = arith.constant 0 : index
    %3 = vector.load %arg2[%c0_3, %c0_4] : memref<1x96xf32, #tpu.memory_space<vmem>>, vector<1x96xf32>
    %4 = vector.broadcast %3 : vector<1x96xf32> to vector<8x96xf32>
    %5 = arith.addf %2, %4 : vector<8x96xf32>
    %6 = vector.extract_strided_slice %5 {offsets = [0, 0], sizes = [8, 64], strides = [1, 1]} : vector<8x96xf32> to vector<8x64xf32>
    %7 = arith.negf %6 : vector<8x64xf32>
    %8 = math.exp %7 : vector<8x64xf32>
    %cst_5 = arith.constant 1.000000e+00 : f32
    %9 = vector.broadcast %cst_5 : f32 to vector<8x64xf32>
    %10 = arith.addf %9, %8 : vector<8x64xf32>
    %11 = arith.divf %9, %10 : vector<8x64xf32>
    %12 = vector.extract_strided_slice %11 {offsets = [0, 0], sizes = [8, 32], strides = [1, 1]} : vector<8x64xf32> to vector<8x32xf32>
    %13 = vector.extract_strided_slice %11 {offsets = [0, 32], sizes = [8, 32], strides = [1, 1]} : vector<8x64xf32> to vector<8x32xf32>
    %14 = vector.extract_strided_slice %5 {offsets = [0, 64], sizes = [8, 32], strides = [1, 1]} : vector<8x96xf32> to vector<8x32xf32>
    %15 = math.tanh %14 : vector<8x32xf32>
    %16 = arith.mulf %12, %15 : vector<8x32xf32>
    %17 = math.tanh %16 : vector<8x32xf32>
    %18 = arith.mulf %13, %17 : vector<8x32xf32>
    %c0_6 = arith.constant 0 : index
    %c0_7 = arith.constant 0 : index
    %19 = vector.load %arg3[%c0_6, %c0_7] : memref<32x128xf32, #tpu.memory_space<vmem>>, vector<32x128xf32>
    %cst_8 = arith.constant dense<0.000000e+00> : vector<8x128xf32>
    %20 = tpu.matmul %18, %19, %cst_8 {dimension_numbers = #tpu.dot_dimension_numbers<[1], [0], [0], [1], [0, 0, 1, 1], [], []>} : vector<8x32xf32>, vector<32x128xf32>, vector<8x128xf32> -> vector<8x128xf32>
    %c0_9 = arith.constant 0 : index
    %c0_10 = arith.constant 0 : index
    %21 = vector.load %arg4[%c0_9, %c0_10] : memref<1x128xf32, #tpu.memory_space<vmem>>, vector<1x128xf32>
    %22 = vector.broadcast %21 : vector<1x128xf32> to vector<8x128xf32>
    %23 = arith.addf %20, %22 : vector<8x128xf32>
    %24 = vector.extract_strided_slice %23 {offsets = [0, 0], sizes = [8, 8], strides = [1, 1]} : vector<8x128xf32> to vector<8x8xf32>
    %c0_11 = arith.constant 0 : index
    %c0_12 = arith.constant 0 : index
    %25 = vector.load %arg5[%c0_11, %c0_12] : memref<8x8xf32, #tpu.memory_space<vmem>>, vector<8x8xf32>
    tpu.vector_store %arg5[%c0_11, %c0_12], %24 {strides = array<i32>} : memref<8x8xf32, #tpu.memory_space<vmem>>, vector<8x8xf32>,
    return
  }
}

</mosaic_0001>

<bundles_post_ra>
// kernel: tpu_custom_call.1
= control target key start
LH: loop header
LB: loop body
LE: loop exit
PB: predicated region body
PF: predicated region fallthrough
CT: control target
= control target key end

     0   :  { %10 = vsyncpa [#allocation3], 0  ;;  %s471_s0 = inlined_call_operand.hbm [shape: f32[8,32], index: 0, kind: input, shape index: {}]   ;;  %s472_s1 = inlined_call_operand.hbm [shape: f32[32,96], index: 1, kind: input, shape index: {}]   ;;  %s473_s2 = inlined_call_operand.vmem [shape: f32[1,96], index: 2, kind: input, shape index: {}]   ;;  %s474_s3 = inlined_call_operand.hbm [shape: f32[32,128], index: 3, kind: input, shape index: {}]   ;;  %s475_s4 = inlined_call_operand.vmem [shape: f32[1,128], index: 4, kind: input, shape index: {}]   ;;  %s476_s5 = inlined_call_operand.hbm [shape: f32[8,8], index: 5, kind: output, shape index: {}]  }
   0x1   :  { %11 = vsyncpa [#allocation6], 0 }
   0x2   :  { %12 = vsyncpa [#allocation4], 0  ;;  %s410_s18 = smov [#allocation5]  }
   0x3   :  { %s28_s19 = sshll.u32 %s410_s18, 4  ;;  %s29_s19 = int_to_ptr.vmem [resolvable:$true] %s28_s19 }
   0x4   :  { %s332_s20 = scalar_lea.vmem %s29_s19, 512  ;;  %p337_p1 = scmp.lt.s32.totalorder %s29_s19, %s29_s19 }
   0x5   :  { %p333_p0 = scmp.ne.s32.totalorder %s29_s19, %s332_s20  ;;  %p338_p2 = scmp.lt.s32.totalorder %s332_s20, %s332_s20 }
   0x7   :  { %p339_p3 = por %p338_p2, %p337_p1 }
   0x9   :  { %p340_p4 = pnand %p339_p3, %p333_p0 }
   0xb   :  { %343 = shalt.err (!%p340_p4)
}
   0xc   :  { %s411_s21 = smov 128   ;;  %s412_s22 = smov 8  }
   0xd   :  { %34 = dma.hbm_to_vmem [thread:$0]  %s472_s1, 512, %s29_s19, [#allocation6], %s411_s21, %s411_s21, %s412_s22  }
   0xe   :  { %s413_s25 = smov [#allocation2]   ;;  %s414_s27 = smov [#allocation7]  }
   0xf   :  { %s19_s26 = sshll.u32 %s413_s25, 4  ;;  %s42_s28 = sshll.u32 %s414_s27, 4  ;;  %s20_s26 = int_to_ptr.vmem [resolvable:$true] %s19_s26  ;;  %s43_s28 = int_to_ptr.vmem [resolvable:$true] %s42_s28 }
  0x10   :  { %s352_s29 = scalar_lea.vmem %s20_s26, 128  ;;  %p357_p6 = scmp.lt.s32.totalorder %s20_s26, %s20_s26 }
  0x11   :  { %p353_p5 = scmp.ne.s32.totalorder %s20_s26, %s352_s29  ;;  %p358_p7 = scmp.lt.s32.totalorder %s352_s29, %s352_s29 }
  0x13   :  { %p359_p8 = por %p358_p7, %p357_p6 }
  0x15   :  { %p360_p9 = pnand %p359_p8, %p353_p5 }
  0x17   :  { %363 = shalt.err (!%p360_p9)
}
  0x18   :  { %22 = dma.hbm_to_vmem [thread:$0]  %s471_s0, 128, %s20_s26, [#allocation3]  }
  0x19   :  { %s372_s7 = scalar_lea.vmem %s43_s28, 512  ;;  %p377_p11 = scmp.lt.s32.totalorder %s43_s28, %s43_s28 }
  0x1a   :  { %p373_p10 = scmp.ne.s32.totalorder %s43_s28, %s372_s7  ;;  %p378_p12 = scmp.lt.s32.totalorder %s372_s7, %s372_s7 }
  0x1c   :  { %p379_p13 = por %p378_p12, %p377_p11 }
  0x1e   :  { %p380_p0 = pnand %p379_p13, %p373_p10 }
  0x20   :  { %383 = shalt.err (!%p380_p0)
}
  0x21   :  { %48 = dma.hbm_to_vmem [thread:$0]  %s474_s3, 512, %s43_s28, [#allocation6], %s411_s21, %s411_s21, %s412_s22  }
  0x22   :  { %404 = dma.done.wait [#allocation3], 128  }
  0x23   :  { %405 = vsyncadd [#allocation3], 4294967168 }
  0x24   :  { %406 = dma.done.wait [#allocation6], 1024  }
  0x25   :  { %407 = vsyncadd [#allocation6], 4294966272  ;;  %v415_v0 = vmov 0.0   ;;  %vm416_vm0 = vmmov 0   ;;  %v64_v1 = vld [vmem:[#allocation5 + $0x18] sm:$0xff]  ;;  %v63_v2 = vld [vmem:[#allocation5 + $0x10] sm:$0xff] }
  0x26   :  { %283 = vmatprep.subr.mxu0 %v415_v0  ;;  %291 = vmatprep.mubr.msk.f32.mxu0 %vm416_vm0, %v415_v0  ;;  %v62_v3 = vld [vmem:[#allocation5 + $0x8] sm:$0xff]  ;;  %v61_v4 = vld [vmem:[#allocation5] sm:$0xff]  ;;  %v60_v5 = vld [vmem:[#allocation2] sm:$0xff]  ;;  %vm72_vm1 = vcmask 261120   ;;  %s417_s9 = smov 64   ;;  %s419_s10 = smov 96  }
  0x27   :  { %294 = vmatprep.subr.mxu1 %v415_v0  ;;  %302 = vmatprep.mubr.msk.f32.mxu1 %vm416_vm0, %v415_v0  ;;  %v268_v6 = vld [vmem:[%s473_s2] ss:$0 sm:$0xff]  ;;  %v166_v18 = vld [vmem:[#allocation7 + $0x10] sm:$0xff]  ;;  %v165_v19 = vld [vmem:[#allocation7 + $0x8] sm:$0xff]  ;;  %s418_s2 = smov 32   ;;  %s420_s13 = smov [#allocation8]  }
  0x28   :  { %284 = vmatpush3.msra.mxu0 %v64_v1  ;;  %v167_v17 = vld [vmem:[#allocation7 + $0x18] sm:$0xff]  ;;  %v164_v20 = vld [vmem:[#allocation7] sm:$0xff]  ;;  %s258_s14 = sshll.u32 %s420_s13, 4  ;;  %vm250_vm2 = vcmask 64512   ;;  %s259_s14 = int_to_ptr.vmem [resolvable:$true] %s258_s14 }
  0x29   :  { %285 = vmatprep.subr.mxu0 %v415_v0  ;;  %295 = vmatpush3.msra.mxu1 %v167_v17  ;;  %v271_v25 = vld [vmem:[%s475_s4] ss:$0 sm:$0xff]  ;;  %s384_s15 = scalar_lea.vmem %s259_s14, 128  ;;  %p389_p2 = scmp.lt.s32.totalorder %s259_s14, %s259_s14 }
  0x2a   :  { %286 = vmatpush3.msra.mxu0 %v63_v2  ;;  %296 = vmatprep.subr.mxu1 %v415_v0  ;;  %p385_p1 = scmp.ne.s32.totalorder %s259_s14, %s384_s15  ;;  %p390_p3 = scmp.lt.s32.totalorder %s384_s15, %s384_s15 }
  0x2b   :  { %287 = vmatprep.subr.mxu0 %v415_v0  ;;  %297 = vmatpush3.msra.mxu1 %v166_v18 }
  0x2c   :  { %288 = vmatpush3.msra.mxu0 %v62_v3  ;;  %298 = vmatprep.subr.mxu1 %v415_v0  ;;  %p391_p4 = por %p390_p3, %p389_p2 }
  0x2d   :  { %289 = vmatprep.subr.mxu0 %v415_v0  ;;  %299 = vmatpush3.msra.mxu1 %v165_v19 }
  0x2e   :  { %290 = vmatpush3.msra.mxu0 %v61_v4  ;;  %300 = vmatprep.subr.mxu1 %v415_v0  ;;  %p392_p5 = pnand %p391_p4, %p385_p1 }
  0x2f   :  { %292 = vmatmul.mubr.msk.f32.vlgmr.msra.gmra.mxu0 %vm72_vm1, %v60_v5  ;;  %301 = vmatpush3.msra.mxu1 %v164_v20 }
  0xef   :  { %v142_v7 = vpop.f32.mrf.mxu0 }
  0xf0   :  { %v143_v8 = vadd.f32 %v268_v6, %v142_v7 }
  0xf1   :  { %v293_v9 = vpop.f32.mrf.mxu0 }
  0xf2   :  { %316 = vtanh.f32 %v143_v8  ;;  %v270_v11 = vmul.f32 -1.442695, %v143_v8 }
  0xf4   :  { %318 = vpow2.f32 %v270_v11 }
  0xff   :  { %v317_v10 = vpop.eup %316 }
 0x100   :  { %154 = vrot.lane.b32.xlu0 %v317_v10, %s417_s9 }
 0x101   :  { %v319_v12 = vpop.eup %318 }
 0x102   :  { %v149_v13 = vadd.f32 1.0, %v319_v12 }
 0x104   :  { %320 = vrcp.f32 %v149_v13 }
 0x111   :  { %v321_v14 = vpop.eup %320 }
 0x172   :  { %v155_v15 = vpop.permute.xlu0 %154 }
 0x173   :  { %v157_v16 = vmul.f32 %v321_v14, %v155_v15 }
 0x175   :  { %322 = vtanh.f32 %v157_v16 }
 0x182   :  { %v323_v21 = vpop.eup %322 }
 0x183   :  { %160 = vrot.lane.b32.xlu0 %v323_v21, %s418_s2 }
 0x1f5   :  { %v161_v22 = vpop.permute.xlu0 %160 }
 0x1f6   :  { %v163_v23 = vmul.f32 %v321_v14, %v161_v22 }
 0x1f8   :  { %176 = vrot.lane.b32.xlu1 %v163_v23, %s419_s10 }
 0x26a   :  { %v177_v24 = vpop.permute.xlu1 %176 }
 0x26b   :  { %303 = vmatmul.mubr.msk.f32.vlgmr.msra.gmra.mxu1 %vm72_vm1, %v177_v24 }
 0x32b   :  { %v246_v26 = vpop.f32.mrf.mxu1 }
 0x32c   :  { %v247_v27 = vadd.f32 %v271_v25, %v246_v26 }
 0x32d   :  { %v304_v28 = vpop.f32.mrf.mxu1 }
 0x32e   :  { %251 = vst.msk [vmem:[#allocation8] sm:$0xff] %vm250_vm2, %v247_v27 }
 0x32f   :  { %395 = shalt.err (!%p392_p5)
}
 0x330   :  { %261 = dma.vmem_to_hbm [thread:$0]  %s259_s14, 128, %s476_s5, [#allocation4]  }
 0x331   :  { %408 = dma.done.wait [#allocation4], 128  }
 0x332   :  { %409 = vsyncadd [#allocation4], 4294967168 }
 0x333   :  { %265 = vsyncpa [#allocation3], 1 }
 0x334   :  { %266 = vsyncpa [#allocation6], 1 }
 0x335   :  { %267 = vsyncpa [#allocation4], 1 }

</bundles_post_ra>
